<compile_context>
chip_gen: v7x
topology: tpu7x:2x2x1
jax: 0.10.0
libtpu: 0.0.40
codegen_flags: <defaults>
</compile_context>

<pallas_src>
import jax
import jax.numpy as jnp
from jax.experimental import pallas as pl
from jax.experimental.pallas import tpu as pltpu


# ----------------------------------------------------------------------------
# Pallas kernel: separable bilinear crop+resize for a block of TB planes.
#   img_ref : (TB, H, W)  input planes (original dtype; cast in-kernel)
#   rh_ref  : (S, H)      row-interpolation matrix (bf16)
#   rwt_ref : (W, S)      column-interpolation matrix, transposed (bf16)
#   out_ref : (TB, S, S)  output planes
# ----------------------------------------------------------------------------
def _crop_resize_kernel(img_ref, rh_ref, rwt_ref, out_ref):
    TB, H, W = img_ref.shape
    S = rwt_ref.shape[1]

    # In-kernel cast (cheap VPU work, avoids a wrapper-side HBM round trip).
    img = img_ref[...].astype(jnp.bfloat16).reshape(TB * H, W)

    # Stage 1: column (W) contraction as ONE stacked matmul, M = TB*H.
    tmp = jnp.dot(img, rwt_ref[...],
                  preferred_element_type=jnp.float32)          # (TB*H, S)
    tmp = tmp.reshape(TB, H, S).astype(jnp.bfloat16)           # (TB, H, S)

    # Stage 2: row (H) contraction, batched over the TB planes (Rh shared).
    rh = jnp.broadcast_to(rh_ref[...], (TB, S, H))             # (TB, S, H)
    out = jnp.einsum('psh,phj->psj', rh, tmp,
                     preferred_element_type=jnp.float32)       # (TB, S, S)
    out_ref[...] = out.astype(out_ref.dtype)


def _choose_plane_block(n, H, W, S, in_bytes, out_bytes):
    """Pick TB (planes per grid step) from a conservative VMEM budget.

    The budget is sized so the same choice is safe on v7x (64 MiB physical
    VMEM) as well as v5e/v6e (128 MiB); the scoped limit is raised to 32 MiB
    in the pallas_call below.
    """
    budget = 20 * 1024 * 1024
    fixed = 2 * (S * H + W * S) * 2            # rh + rwt blocks (bf16, 2-buffered)
    per_plane = (2 * H * W * in_bytes          # input block (double-buffered)
                 + 2 * S * S * out_bytes       # output block (double-buffered)
                 + H * W * 2                   # in-kernel bf16 copy of the input
                 + H * S * (4 + 2)             # stage-1 f32 accum + bf16 copy
                 + S * H * 2                   # broadcast Rh
                 + S * S * 4)                  # stage-2 f32 accum
    tb_max = max(1, int((budget - fixed) // per_plane))
    # Keep >= 2 grid steps so v7x's two TensorCores both get work and the
    # input/output pipeline has something to overlap with.
    cap = min(tb_max, max(1, n // 2)) if n >= 2 else 1
    best = None
    for cand in range(cap, 0, -1):
        if n % cand == 0:
            if best is None:
                best = cand
            if (n // cand) % 2 == 0:           # prefer an even grid extent
                return cand
    return best if best is not None else 1


def _crop_resize_pallas(x, rh, rw):
    """x: (B, C, H, W); rh: (S, H); rw: (S, W) -> (B, C, S, S)."""
    B, C, H, W = x.shape
    S = rh.shape[0]
    n = B * C
    img = x.reshape(n, H, W)
    out_dtype = x.dtype if jnp.issubdtype(x.dtype, jnp.floating) else jnp.float32

    rh_b = rh.astype(jnp.bfloat16)       # (S, H)
    rwt_b = rw.T.astype(jnp.bfloat16)    # (W, S)

    tb = _choose_plane_block(n, H, W, S,
                             jnp.dtype(x.dtype).itemsize,
                             jnp.dtype(out_dtype).itemsize)
    grid = n // tb

    out = pl.pallas_call(
        _crop_resize_kernel,
        out_shape=jax.ShapeDtypeStruct((n, S, S), out_dtype),
        grid_spec=pltpu.PrefetchScalarGridSpec(
            num_scalar_prefetch=0,
            grid=(grid,),
            in_specs=[
                pl.BlockSpec((tb, H, W), lambda i: (i, 0, 0)),
                pl.BlockSpec((S, H), lambda i: (0, 0)),
                pl.BlockSpec((W, S), lambda i: (0, 0)),
            ],
            out_specs=pl.BlockSpec((tb, S, S), lambda i: (i, 0, 0)),
        ),
        compiler_params=pltpu.CompilerParams(
            dimension_semantics=("parallel",),
            vmem_limit_bytes=32 * 1024 * 1024),
    )(img, rh_b, rwt_b)
    return out.reshape(B, C, S, S)


# ----------------------------------------------------------------------------
# Glue (plain JAX): crop parameter sampling, interpolation matrices, homography.
# ----------------------------------------------------------------------------
def _interp_matrix(start, crop_len, in_len, out_len):
    """Bilinear (align_corners=True) interpolation matrix (out_len, in_len)."""
    j = jnp.arange(out_len, dtype=jnp.float32)
    denom = float(max(out_len - 1, 1))
    src = start + j * (crop_len - 1.0) / denom
    src = jnp.clip(src, 0.0, float(in_len - 1))
    lo = jnp.floor(src)
    frac = src - lo
    cols = jnp.arange(in_len, dtype=jnp.float32)[None, :]
    w0 = (cols == lo[:, None]).astype(jnp.float32) * (1.0 - frac)[:, None]
    w1 = (cols == (lo[:, None] + 1.0)).astype(jnp.float32) * frac[:, None]
    return w0 + w1


def _normal_transform_pixel(h, w):
    return jnp.array(
        [[2.0 / (w - 1.0), 0.0, -1.0],
         [0.0, 2.0 / (h - 1.0), -1.0],
         [0.0, 0.0, 1.0]], dtype=jnp.float32)


def _normalize_homography(mat, src_hw, dst_hw):
    """kornia.geometry.conversions.normalize_homography for (B, 3, 3) mats."""
    src_norm_trans_src_pix = _normal_transform_pixel(*src_hw)
    src_pix_trans_src_norm = jnp.linalg.inv(src_norm_trans_src_pix)
    dst_norm_trans_dst_pix = _normal_transform_pixel(*dst_hw)
    return dst_norm_trans_dst_pix[None] @ mat @ src_pix_trans_src_norm[None]


def random_resized_crop_hflip(x, key, size, aug_scale, aug_ratio):
    """Forward pass of RandomResizedCropHFilp (same_on_batch=True, debug=False).

    Returns (cropped_resized, transmat) with shapes (B, C, size, size), (B, 3, 3).
    """
    B, C, H, W = x.shape
    S = size
    k_area, k_ratio, k_x, k_y = jax.random.split(key, 4)

    # --- sample one crop box for the whole batch (same_on_batch=True) ---
    area_frac = jax.random.uniform(
        k_area, (), jnp.float32, aug_scale[0], aug_scale[1])
    log_ratio = jax.random.uniform(
        k_ratio, (), jnp.float32,
        jnp.log(jnp.float32(aug_ratio[0])), jnp.log(jnp.float32(aug_ratio[1])))
    ratio = jnp.exp(log_ratio)
    target_area = area_frac * float(H * W)
    w_crop = jnp.clip(jnp.round(jnp.sqrt(target_area * ratio)), 2.0, float(W))
    h_crop = jnp.clip(jnp.round(jnp.sqrt(target_area / ratio)), 2.0, float(H))
    x0 = jnp.floor(jax.random.uniform(k_x, (), jnp.float32) * (W - w_crop + 1.0))
    y0 = jnp.floor(jax.random.uniform(k_y, (), jnp.float32) * (H - h_crop + 1.0))
    x0 = jnp.clip(x0, 0.0, float(W) - w_crop)
    y0 = jnp.clip(y0, 0.0, float(H) - h_crop)

    # --- interpolation matrices (row / column), align_corners=True ---
    rh = _interp_matrix(y0, h_crop, H, S)   # (S, H)
    rw = _interp_matrix(x0, w_crop, W, S)   # (S, W)

    # --- hot path: bilinear crop+resize on TPU via Pallas (no wrapper cast) ---
    out = _crop_resize_pallas(x, rh, rw)

    # --- pixel-space transform (src pixel -> dst pixel), then normalize ---
    sx = (S - 1.0) / (w_crop - 1.0)
    sy = (S - 1.0) / (h_crop - 1.0)
    transmat = jnp.stack([
        jnp.stack([sx, jnp.float32(0.0), -x0 * sx]),
        jnp.stack([jnp.float32(0.0), sy, -y0 * sy]),
        jnp.array([0.0, 0.0, 1.0], jnp.float32),
    ])                                           # (3, 3)
    transmat = jnp.broadcast_to(transmat, (B, 3, 3))
    transmat = _normalize_homography(transmat, (H, W), (S, S))
    return out, transmat


# TODO(synk): the module name mentions HFlip but the reference forward() only
# applies RandomResizedCrop, so no horizontal flip is performed here either.


if __name__ == "__main__":
    key = jax.random.PRNGKey(0)
    k_data, k_aug = jax.random.split(key)

    B, C, H, W = 2, 4, 16, 16
    size = 8
    aug_scale = (0.3, 1.0)
    aug_ratio = (0.75, 1.3333333)

    x = jax.random.normal(k_data, (B, C, H, W), dtype=jnp.float32)

    out, transmat = random_resized_crop_hflip(x, k_aug, size, aug_scale, aug_ratio)
    out = jax.block_until_ready(out)
    transmat = jax.block_until_ready(transmat)

    assert out.shape == (B, C, size, size)
    assert transmat.shape == (B, 3, 3)
    assert out.dtype == jnp.float32 and transmat.dtype == jnp.float32
    print("KERNEL_OK")
</pallas_src>

<mosaic_0001>
module attributes {stable_mosaic.version = 11 : i64} {
  func.func @_crop_resize_kernel(%arg0: i32, %arg1: memref<4x16x16xf32, #tpu.memory_space<vmem>>, %arg2: memref<8x16xbf16, #tpu.memory_space<vmem>>, %arg3: memref<16x8xbf16, #tpu.memory_space<vmem>>, %arg4: memref<4x8x8xf32, #tpu.memory_space<vmem>>) attributes {dimension_semantics = [#tpu.dimension_semantics<parallel>], iteration_bounds = array<i64: 2>, scalar_prefetch = 0 : i64, scratch_operands = 0 : i64, tpu.core_type = #tpu.core_type<tc>, window_params = [{transform_indices = @transform_0, window_bounds = array<i64: 4, 16, 16>}, {pipeline_mode = #tpu.pipeline_mode<synchronous>, transform_indices = @transform_1, window_bounds = array<i64: 8, 16>}, {pipeline_mode = #tpu.pipeline_mode<synchronous>, transform_indices = @transform_2, window_bounds = array<i64: 16, 8>}, {transform_indices = @transform_3, window_bounds = array<i64: 4, 8, 8>}]} {
    %c0 = arith.constant 0 : index
    %c0_0 = arith.constant 0 : index
    %c0_1 = arith.constant 0 : index
    %0 = vector.load %arg1[%c0, %c0_0, %c0_1] : memref<4x16x16xf32, #tpu.memory_space<vmem>>, vector<4x16x16xf32>
    %1 = arith.truncf %0 : vector<4x16x16xf32> to vector<4x16x16xbf16>
    %2 = vector.shape_cast %1 : vector<4x16x16xbf16> to vector<64x16xbf16>
    %c0_2 = arith.constant 0 : index
    %c0_3 = arith.constant 0 : index
    %3 = vector.load %arg3[%c0_2, %c0_3] : memref<16x8xbf16, #tpu.memory_space<vmem>>, vector<16x8xbf16>
    %cst = arith.constant dense<0.000000e+00> : vector<64x8xf32>
    %4 = tpu.matmul %2, %3, %cst {dimension_numbers = #tpu.dot_dimension_numbers<[1], [0], [0], [1], [0, 0, 1, 1], [], []>} : vector<64x16xbf16>, vector<16x8xbf16>, vector<64x8xf32> -> vector<64x8xf32>
    %5 = vector.shape_cast %4 : vector<64x8xf32> to vector<4x16x8xf32>
    %6 = arith.truncf %5 : vector<4x16x8xf32> to vector<4x16x8xbf16>
    %c0_4 = arith.constant 0 : index
    %c0_5 = arith.constant 0 : index
    %7 = vector.load %arg2[%c0_4, %c0_5] : memref<8x16xbf16, #tpu.memory_space<vmem>>, vector<8x16xbf16>
    %8 = vector.shape_cast %7 : vector<8x16xbf16> to vector<1x8x16xbf16>
    %9 = vector.broadcast %8 : vector<1x8x16xbf16> to vector<4x8x16xbf16>
    "tpu.trace_start"() <{level = 10 : i32, message = "psh,phj->psj"}> : () -> ()
    %cst_6 = arith.constant dense<0.000000e+00> : vector<4x8x8xf32>
    %10 = tpu.matmul %9, %6, %cst_6 {dimension_numbers = #tpu.dot_dimension_numbers<[2], [1], [1], [2], [0, 0, 0, 1, 1, 2], [0], [0]>} : vector<4x8x16xbf16>, vector<4x16x8xbf16>, vector<4x8x8xf32> -> vector<4x8x8xf32>
    "tpu.trace_stop"() : () -> ()
    %c0_7 = arith.constant 0 : index
    %c0_8 = arith.constant 0 : index
    %c0_9 = arith.constant 0 : index
    %11 = vector.load %arg4[%c0_7, %c0_8, %c0_9] : memref<4x8x8xf32, #tpu.memory_space<vmem>>, vector<4x8x8xf32>
    tpu.vector_store %arg4[%c0_7, %c0_8, %c0_9], %10 {strides = array<i32>} : memref<4x8x8xf32, #tpu.memory_space<vmem>>, vector<4x8x8xf32>,
    return
  }
  func.func @transform_0(%arg0: i32) -> (i32, i32, i32) {
    %c0_i32 = arith.constant 0 : i32
    %c0_i32_0 = arith.constant 0 : i32
    %c0_i32_1 = arith.constant 0 : i32
    return %arg0, %c0_i32, %c0_i32_0 : i32, i32, i32
  }
  func.func @transform_1(%arg0: i32) -> (i32, i32) {
    %c0_i32 = arith.constant 0 : i32
    %c0_i32_0 = arith.constant 0 : i32
    %c0_i32_1 = arith.constant 0 : i32
    return %c0_i32, %c0_i32_0 : i32, i32
  }
  func.func @transform_2(%arg0: i32) -> (i32, i32) {
    %c0_i32 = arith.constant 0 : i32
    %c0_i32_0 = arith.constant 0 : i32
    %c0_i32_1 = arith.constant 0 : i32
    return %c0_i32, %c0_i32_0 : i32, i32
  }
  func.func @transform_3(%arg0: i32) -> (i32, i32, i32) {
    %c0_i32 = arith.constant 0 : i32
    %c0_i32_0 = arith.constant 0 : i32
    %c0_i32_1 = arith.constant 0 : i32
    return %arg0, %c0_i32, %c0_i32_0 : i32, i32, i32
  }
}

</mosaic_0001>

<bundles_post_ra>
// kernel: tpu_custom_call.1
= control target key start
LH: loop header
LB: loop body
LE: loop exit
PB: predicated region body
PF: predicated region fallthrough
CT: control target
= control target key end

     0   :  { %8 = vsyncpa [#allocation3], 0  ;;  %s989_s0 = inlined_call_operand.hbm [shape: f32[8,16,16], index: 0, kind: input, shape index: {}]   ;;  %s990_s1 = inlined_call_operand.vmem [shape: bf16[8,16], index: 1, kind: input, shape index: {}]   ;;  %s991_s2 = inlined_call_operand.vmem [shape: bf16[16,8], index: 2, kind: input, shape index: {}]   ;;  %s992_s3 = inlined_call_operand.hbm [shape: f32[8,8,8], index: 3, kind: output, shape index: {}]  }
   0x1   :  { %10 = vsyncpa [#allocation3 + $0x1], 0 }
   0x2   :  { %11 = vsyncpa [#allocation4], 0 }
   0x3   :  { %13 = vsyncpa [#allocation4 + $0x1], 0  ;;  %s804_s12 = smov 0   ;;  %s806_s13 = smov 0  }
   0x4   :  { %s808_s14 = smov 0   ;;  %s810_s15 = smov 0  }
   0x5 LB: > { %s825_s16 = sadd.s32 4294967295, %s774_s15   ;;  %s551_s17 = sadd.s32 4294967294, %s774_s15   ;;  %s774_s15 = sphi %s810_s15, %s1005_s15   ;;  %s770_s14 = sphi %s808_s14, %s1004_s14   ;;  %s766_s13 = sphi %s806_s13, %s1003_s13   ;;  %s762_s12 = sphi %s804_s12, %s1002_s12  }
   0x6   : > { %s829_s18 = sadd.s32 1, %s774_s15   ;;  %s26_s19 = sadd.s32 1, %s770_s14 }
   0x7   : > { %s23_s20 = ssub.s32 %s774_s15, %s829_s18  ;;  %p33_p0 = scmp.ne.s32.totalorder %s770_s14, %s766_s13 }
   0x8   : > { %p24_p1 = scmp.eq.s32.totalorder %s23_s20, 0  ;;  %p34_p2 = scmp.eq.s32.totalorder %s774_s15, 0 }
   0x9   : > { %p39_p3 = scmp.ne.s32.totalorder %s766_s13, %s762_s12  ;;  %p40_p4 = scmp.eq.s32.totalorder %s825_s16, 0 }
   0xa   : > { %s841_s21 = scalar_select %p24_p1, %s770_s14, %s26_s19  }
   0xb   : > { %p843_p5 = por %p34_p2, %p33_p0  ;;  %p847_p6 = por %p40_p4, %p39_p3 }
   0xc   : > { %p105_p7 = scmp.eq.s32.totalorder %s825_s16, 1  ;;  %p111_p8 = scmp.eq.s32.totalorder %s551_s17, 1 }
   0xd   : > { %p637_p10 = scmp.lt.s32.totalorder %s774_s15, 2  ;;  %s137_s26 = sand.u32 1, %s770_s14  }
   0xe   : > { %p854_p11 = por %p105_p7, %p33_p0  ;;  %p858_p12 = por %p111_p8, %p39_p3 }
   0xf   : > { %s576_s27 = sshll.u32 %s774_s15, 10  ;;  %s554_s28 = sshll.u32 %s137_s26, 6 }
  0x10   : > { %s996_s24 = scalar_select %p854_p11, 1, 0 }
  0x11   : > { %s997_s25 = scalar_select %p858_p12, 1, 0 }
  0x12   : > { %s867_s4 = scalar_lea.hbm %s989_s0, %s576_s27  ;;  %s141_s5 = scalar_lea.vmem [#allocation2], %s554_s28 }
  0x13   : > { %s149_s6 = sshll.u32 %s141_s5, 4  ;;  %p871_p13 = pnand %p637_p10, %p843_p5  ;;  %s875_s6 = int_to_ptr.vmem [resolvable:$true] %s149_s6 }
  0x14   : > { %s877_s8 = scalar_lea.sflag [#allocation3], %s137_s26  ;;  %s678_s9 = scalar_lea.hbm %s867_s4, 1024 }
  0x15   : > { %p679_p0 = scmp.ne.s32.totalorder %s867_s4, %s678_s9  ;;  %p680_p1 = pneg %p871_p13 }
  0x16   : > { %s683_s17 = scalar_lea.hbm %s989_s0, 2048  ;;  %p684_p4 = scmp.lt.u32.totalorder %s867_s4, %s989_s0 }
  0x17   : > { %p681_p2 = pnand %p680_p1, %p679_p0  ;;  %p685_p5 = scmp.lt.u32.totalorder %s683_s17, %s678_s9 }
  0x18   : > { %p687_p8 = scmp.lt.u32.totalorder %s678_s9, %s867_s4 }
  0x19   : > { %p682_p3 = pneg %p681_p2  ;;  %p686_p7 = por %p685_p5, %p684_p4 }
  0x1b   : > { %p688_p10 = por %p687_p8, %p686_p7 }
  0x1d   : > { %p689_p9 = pnand %p688_p10, %p682_p3 }
  0x1f   : > { %692 = shalt.err (!%p689_p9)
}
  0x20   : > { %s693_s22 = scalar_lea.vmem %s875_s6, 1024  ;;  %s776_s26 = smov [#allocation2]  }
  0x21   : > { %p694_p0 = scmp.ne.s32.totalorder %s875_s6, %s693_s22  ;;  %s698_s27 = sshll.u32 %s776_s26, 4  ;;  %s699_s27 = int_to_ptr.vmem [resolvable:$false] %s698_s27 }
  0x22   : > { %s700_s28 = scalar_lea.vmem %s699_s27, 2048  ;;  %p701_p11 = scmp.lt.s32.totalorder %s875_s6, %s699_s27 }
  0x23   : > { %p696_p2 = pnand %p694_p0, %p680_p1  ;;  %p702_p4 = scmp.lt.s32.totalorder %s700_s28, %s693_s22 }
  0x25   : > { %p697_p12 = pneg %p696_p2  ;;  %p703_p5 = por %p702_p4, %p701_p11 }
  0x27   : > { %p704_p7 = pnand %p703_p5, %p697_p12 }
  0x29   : > { %707 = shalt.err (!%p704_p7)
}
  0x2a   : > { %s777_s29 = smov 128   ;;  %s778_s30 = smov 8  }
  0x2b   : > { %632 = dma.hbm_to_vmem [thread:$0]  (!%p871_p13), %s867_s4, 1024, %s875_s6, %s877_s8, %s777_s29, %s777_s29, %s778_s30  }
  0x2c   : > { %p558_p9 = scmp.ge.s32.totalorder %s774_s15, 1  ;;  %p157_p1 = scmp.lt.s32.totalorder %s774_s15, 3 }
  0x2e   : > { %p158_p3 = pnand %p558_p9, %p157_p1 }
  0x2f   : > { %s908_s5 = sand.u32 (!%p158_p3), 1, %s766_s13  }
  0x30   : > { %161 = sbr.rel (%p158_p3) target bundleno = 525 (0x20d), region = 32  ;;  %s559_s9 = sshll.u32 (!%p158_p3), %s908_s5, 6 }
  0x31   : > { %s164_s10 = scalar_lea.sflag (!%p158_p3), [#allocation3], %s908_s5  ;;  %s167_s11 = scalar_lea.vmem (!%p158_p3), [#allocation2], %s559_s9 }
  0x37   : > { %753 = dma.done.wait (%p847_p6), %s164_s10, 1024  }
  0x38   : > { %755 = vsyncadd (%p847_p6), %s164_s10, 4294966272  ;;  %v677_v0 = vld [vmem:[%s991_s2] sm:$0xff]   ;;  %v194_v2 = vld [vmem:[%s167_s11 + $0x8] sm:$0xff]  ;;  %vm213_vm0 = vcmask 130048   ;;  %v779_v13 = vmov 0.0   ;;  %vm780_vm1 = vmmov 0  }
  0x39   : > { %v193_v1 = vld [vmem:[%s167_s11] sm:$0xff]  ;;  %v195_v3 = vld [vmem:[%s167_s11 + $0x10] sm:$0xff]  ;;  %591 = vmatprep.subr.bf16.mxu0 %v677_v0  ;;  %v196_v5 = vld [vmem:[%s167_s11 + $0x18] sm:$0xff]  ;;  %601 = vmatprep.subr.bf16.mxu1 %v779_v13  ;;  %s560_s8 = sshll.u32 %s908_s5, 5  ;;  %vm459_vm2 = vcmask 64512   ;;  %s577_s20 = sshll.u32 %s825_s16, 9 }
  0x3a   : > { %v201_v4 = vpack.c.bf16 %v194_v2, %v193_v1  ;;  %v197_v6 = vld [vmem:[%s167_s11 + $0x20] sm:$0xff]  ;;  %v198_v7 = vld [vmem:[%s167_s11 + $0x28] sm:$0xff]  ;;  %592 = vmatpush3.bf16.msra.mxu0 %v677_v0  ;;  %v202_v8 = vpack.c.bf16 %v196_v5, %v195_v3  ;;  %v199_v10 = vld [vmem:[%s167_s11 + $0x30] sm:$0xff]  ;;  %603 = vmatprep.mubr.msk.bf16.mxu1 %vm780_vm1, %v779_v13  ;;  %s189_s17 = scalar_lea.vmem [#allocation5], %s560_s8  ;;  %s944_s27 = scalar_lea.hbm %s992_s3, %s577_s20 }
  0x3b   : > { %v203_v9 = vpack.c.bf16 %v198_v7, %v197_v6  ;;  %v200_v11 = vld [vmem:[%s167_s11 + $0x38] sm:$0xff]  ;;  %613 = vmatprep.subr.bf16.mxu0 %v779_v13  ;;  %v295_v20 = vld [vmem:[%s990_s1] sm:$0xf]  ;;  %s478_s19 = sshll.u32 %s189_s17, 4  ;;  %s465_s28 = scalar_lea.sflag [#allocation4], %s908_s5  ;;  %s939_s19 = int_to_ptr.vmem [resolvable:$true] %s478_s19 }
  0x3c   : > { %593 = vmatprep.mubr.msk.bf16.mxu0 %vm213_vm0, %v201_v4  ;;  %v204_v12 = vpack.c.bf16 %v200_v11, %v199_v10  ;;  %s708_s29 = scalar_lea.vmem %s939_s19, 512  ;;  %p999_p11 = scmp.ne.s32.totalorder %s996_s24, 0 }
  0x3d   : > { %594 = vmatmul.mubr.msk.bf16.vlgmr.msra.gmra.mrb[0].mxu0 %vm213_vm0, %v202_v8  ;;  %p709_p6 = scmp.ne.s32.totalorder %s939_s19, %s708_s29  ;;  %s781_s16 = smov [#allocation5]  }
  0x3e   : > { %597 = vmatprep.mubr.msk.bf16.mxu0 %vm213_vm0, %v203_v9  ;;  %s712_s30 = sshll.u32 %s781_s16, 4  ;;  %s713_s30 = int_to_ptr.vmem [resolvable:$false] %s712_s30 }
  0x3f   : > { %p710_p12 = pnand %p709_p6, %p999_p11  ;;  %s714_s9 = scalar_lea.vmem %s713_s30, 1024 }
  0x40   : > { %p715_p8 = scmp.lt.s32.totalorder %s939_s19, %s713_s30  ;;  %p716_p10 = scmp.lt.s32.totalorder %s714_s9, %s708_s29 }
  0x41   : > { %p711_p13 = pneg %p710_p12 }
  0x42   : > { %p717_p0 = por %p716_p10, %p715_p8 }
  0x44   : > { %p718_p2 = pnand %p717_p0, %p711_p13 }
  0x45   : > { %598 = vmatmul.mubr.msk.bf16.gmra.mrb[4].mxu0 %vm213_vm0, %v204_v12 }
  0x46   : > { %615 = vmatprep.mubr.msk.bf16.mxu0 %vm780_vm1, %v779_v13 }
 0x110   : > { %v595_v14 = vpop.f32.mrb[0].mxu0 }
 0x111   : > { %v260_v15 = vpop.f32.mrb[1].mxu0 }
 0x112   : > { %v596_v16 = vpop.f32.mrb[2].mxu0 }
 0x113   : > { %v292_v17 = vpack.c.bf16 %v596_v16, %v595_v14  ;;  %v263_v18 = vpop.f32.mrb[3].mxu0 }
 0x114   : > { %v291_v19 = vpack.c.bf16 %v263_v18, %v260_v15 }
 0x116   : > { %602 = vmatpush3.bf16.msra.mxu1 %v291_v19 }
 0x117   : > { %607 = vmatprep.subr.bf16.mxu1 %v779_v13 }
 0x118   : > { %v599_v21 = vpop.f32.mrb[4].mxu0 }
 0x119   : > { %v276_v22 = vpop.f32.mrb[5].mxu0  ;;  %604 = vmatmul.mubr.msk.bf16.vlgmr.msra.gmra.mrb[0].mxu1 %vm213_vm0, %v295_v20 }
 0x11a   : > { %v600_v23 = vpop.f32.mrb[6].mxu0  ;;  %608 = vmatpush3.bf16.msra.mxu1 %v292_v17  ;;  %609 = vmatprep.mubr.msk.bf16.mxu1 %vm780_vm1, %v779_v13 }
 0x11b   : > { %v294_v24 = vpack.c.bf16 %v600_v23, %v599_v21  ;;  %v279_v25 = vpop.f32.mrb[7].mxu0  ;;  %619 = vmatprep.subr.bf16.mxu1 %v779_v13 }
 0x11c   : > { %v293_v26 = vpack.c.bf16 %v279_v25, %v276_v22 }
 0x11e   : > { %614 = vmatpush3.bf16.msra.mxu0 %v293_v26 }
 0x121   : > { %610 = vmatmul.mubr.msk.bf16.vlgmr.msra.gmra.mrb[4].mxu1 %vm213_vm0, %v295_v20  ;;  %616 = vmatmul.mubr.msk.bf16.vlgmr.msra.gmra.mrb[8].mxu0 %vm213_vm0, %v295_v20 }
 0x122   : > { %620 = vmatpush3.bf16.msra.mxu1 %v294_v24  ;;  %621 = vmatprep.mubr.msk.bf16.mxu1 %vm780_vm1, %v779_v13 }
 0x129   : > { %622 = vmatmul.mubr.msk.bf16.vlgmr.msra.gmra.mrb[8].mxu1 %vm213_vm0, %v295_v20 }
 0x1ec   : > { %v333_v27 = vpop.f32.mrb[0].mxu1 }
 0x1ed   : > { %460 = vst.msk [vmem:[%s189_s17] sm:$0xff] %vm459_vm2, %v333_v27  ;;  %v605_v28 = vpop.f32.mrb[1].mxu1 }
 0x1ee   : > { %v336_v29 = vpop.f32.mrb[2].mxu1 }
 0x1ef   : > { %v606_v30 = vpop.f32.mrb[3].mxu1 }
 0x1f4   : > { %v373_v31 = vpop.f32.mrb[4].mxu1  ;;  %v413_v32 = vpop.f32.mrb[8].mxu0 }
 0x1f5   : > { %461 = vst.msk [vmem:[%s189_s17 + $0x8] sm:$0xff] %vm459_vm2, %v373_v31  ;;  %v611_v33 = vpop.f32.mrb[5].mxu1  ;;  %462 = vst.msk [vmem:[%s189_s17 + $0x10] sm:$0xff] %vm459_vm2, %v413_v32  ;;  %v617_v34 = vpop.f32.mrb[9].mxu0 }
 0x1f6   : > { %v376_v35 = vpop.f32.mrb[6].mxu1  ;;  %v416_v36 = vpop.f32.mrb[10].mxu0 }
 0x1f7   : > { %v612_v37 = vpop.f32.mrb[7].mxu1  ;;  %v618_v38 = vpop.f32.mrb[11].mxu0 }
 0x1fc   : > { %v453_v39 = vpop.f32.mrb[8].mxu1 }
 0x1fd   : > { %463 = vst.msk [vmem:[%s189_s17 + $0x18] sm:$0xff] %vm459_vm2, %v453_v39  ;;  %v623_v40 = vpop.f32.mrb[9].mxu1 }
 0x1fe   : > { %v456_v41 = vpop.f32.mrb[10].mxu1 }
 0x1ff   : > { %721 = shalt.err (!%p718_p2)
}
 0x200   : > { %s722_s10 = scalar_lea.hbm %s944_s27, 512  ;;  %s726_s4 = scalar_lea.hbm %s992_s3, 1024 }
 0x201   : > { %p723_p4 = scmp.ne.s32.totalorder %s944_s27, %s722_s10  ;;  %p727_p9 = scmp.lt.u32.totalorder %s944_s27, %s992_s3 }
 0x202   : > { %p728_p1 = scmp.lt.u32.totalorder %s726_s4, %s722_s10  ;;  %p730_p6 = scmp.lt.u32.totalorder %s722_s10, %s944_s27 }
 0x203   : > { %p724_p5 = pnand %p723_p4, %p999_p11 }
 0x204   : > { %p729_p3 = por %p728_p1, %p727_p9 }
 0x205   : > { %p725_p7 = pneg %p724_p5 }
 0x206   : > { %p731_p12 = por %p730_p6, %p729_p3 }
 0x208   : > { %p732_p13 = pnand %p731_p12, %p725_p7 }
 0x20a   : > { %735 = shalt.err (!%p732_p13)
}
 0x20b   : > { %s782_s8 = smov 128   ;;  %s783_s17 = smov 8   ;;  %v624_v42 = vpop.f32.mrb[11].mxu1 }
 0x20c   : > { %627 = dma.vmem_to_hbm [thread:$0]  (%p999_p11), %s939_s19, 512, %s944_s27, %s465_s28, %s782_s8, %s782_s8, %s783_s17  }
 0x20d PF: > { %s493_s20 = sand.u32 1, %s762_s12   ;;  %p1000_p8 = scmp.ne.s32.totalorder %s997_s25, 0 }
 0x20e   : > { %p1001_p10 = scmp.ge.s32.totalorder %s774_s15, 2  ;;  %s494_s22 = scalar_lea.sflag [#allocation4], %s493_s20 }
 0x210   : > { %p634_p0 = pnand %p1001_p10, %p1000_p8 }
 0x212   : > { %757 = dma.done.wait (!%p634_p0), %s494_s22, 512  }
 0x213   : > { %759 = vsyncadd (!%p634_p0), %s494_s22, 4294966784  ;;  %p16_p2 = scmp.ge.s32.totalorder %s829_s18, 4   ;;  %s1002_s12 = smov %s766_s13 }
 0x214   : > { %s1003_s13 = smov %s770_s14  ;;  %s1004_s14 = smov %s841_s21 }
 0x215   : > { %s1005_s15 = smov %s829_s18  ;;  %18 = sbr.rel (!%p16_p2) target bundleno = 5 (0x5), region = 77 }
 0x21c   :  { %499 = vsyncpa [#allocation3], 1 }
 0x21d   :  { %501 = vsyncpa [#allocation3 + $0x1], 1 }
 0x21e   :  { %502 = vsyncpa [#allocation4], 1 }
 0x21f   :  { %504 = vsyncpa [#allocation4 + $0x1], 1 }

</bundles_post_ra>
